<compile_context>
chip_gen: v6e
topology: v6e:2x2x1
jax: 0.10.0
libtpu: 0.0.40
codegen_flags: <defaults>
</compile_context>

<pallas_src>
import functools

import jax
import jax.numpy as jnp
from jax.experimental import pallas as pl
from jax.experimental.pallas import tpu as pltpu


def _round_up(x, m):
    return ((x + m - 1) // m) * m


def _cdiv(a, b):
    return -(-a // b)


def gmf_kernel(uidx_ref, iidx_ref, ut_hbm, it_hbm, bias_ref, o_ref,
               u_rows, i_rows, sem):
    """One batch tile.

    uidx_ref, iidx_ref : (B_pad,)       SMEM  int32 embedding row indices (prefetched)
    ut_hbm             : (n_users, E)   HBM   user table with Linear weight pre-folded
    it_hbm             : (n_items, E)   HBM   item table
    bias_ref           : (1, 1)         SMEM  linear bias (scalar)
    o_ref              : (TB, 1)        VMEM  sigmoid(logits) for this tile
    u_rows, i_rows     : (TB, E)        VMEM  gathered-row staging buffers
    sem                : (2,)           DMA semaphores (user / item)
    """
    tb, _ = u_rows.shape
    base = pl.program_id(0) * tb

    def row_copy(tbl_hbm, row, dst, dst_row, s):
        return pltpu.make_async_copy(
            tbl_hbm.at[pl.ds(row, 1), :], dst.at[pl.ds(dst_row, 1), :], s)

    # Phase 1: issue all row-gather DMAs for this tile (up to 2*TB in flight).
    @pl.loop(0, tb)
    def _issue(b):
        row_copy(ut_hbm, uidx_ref[base + b], u_rows, b, sem.at[0]).start()
        row_copy(it_hbm, iidx_ref[base + b], i_rows, b, sem.at[1]).start()

    # Phase 2: wait for all of them.  All copies are homogeneous (one (1, E)
    # row each) and share one semaphore per table, so TB waits balance TB starts.
    @pl.loop(0, tb)
    def _wait(b):
        row_copy(ut_hbm, 0, u_rows, b, sem.at[0]).wait()
        row_copy(it_hbm, 0, i_rows, b, sem.at[1]).wait()

    # Phase 3: fused GMF math.  Linear weight already folded into u_rows, so
    # logits[b] = sum_e (u*w)[b,e] * i[b,e] + bias.
    prod = u_rows[...] * i_rows[...]                        # (TB, E)  VPU
    logits = jnp.sum(prod, axis=1, keepdims=True)           # (TB, 1)  lane reduce
    o_ref[...] = jax.nn.sigmoid(logits + bias_ref[0, 0])    # EUP sigmoid


def prepare_gmf_params(user_table, weight):
    """One-time (model-init) layout prep: fold nn.Linear weight into the user table.

    Keeps the full-table pass out of the per-call jitted forward.
    """
    e = user_table.shape[1]
    return (user_table * weight.reshape(1, e)).astype(jnp.float32)


@functools.partial(jax.jit, static_argnames=("block_b",))
def gmf_forward(user_input, item_input, user_table_w, item_table, bias,
                *, block_b=1024):
    """GMF forward.

    user_input, item_input : (B,)          int indices
    user_table_w           : (n_users, E)  f32  (weight pre-folded, see prepare_gmf_params)
    item_table             : (n_items, E)  f32
    bias                   : (1,)          f32
    returns                : (B, 1)        f32
    """
    B = user_input.shape[0]
    _, E = item_table.shape

    # --- batch tiling: pad to a multiple of 8 (sublane quantum), spread rows
    # evenly over tiles so padding waste stays < 8 * num_tiles, and use >= 2
    # tiles when the batch allows so both v7x TensorCores get work.
    b_min = _round_up(B, 8)
    num_tiles = max(1, _cdiv(b_min, block_b))
    if num_tiles == 1 and b_min >= 16:
        num_tiles = 2
    tb = _round_up(_cdiv(b_min, num_tiles), 8)
    b_pad = num_tiles * tb

    # Pad index vectors with 0 (valid row); pad rows are computed then sliced off.
    uidx = jnp.zeros((b_pad,), jnp.int32).at[:B].set(user_input.astype(jnp.int32))
    iidx = jnp.zeros((b_pad,), jnp.int32).at[:B].set(item_input.astype(jnp.int32))

    ut = user_table_w.astype(jnp.float32)
    it = item_table.astype(jnp.float32)
    b2 = jnp.asarray(bias, jnp.float32).reshape(1, 1)

    # VMEM: two (TB, E) staging buffers + double-buffered (TB, 1) output tile.
    vmem_needed = 2 * tb * E * 4 + 2 * tb * 4 * 2
    vmem_limit = int(min(64 * 1024 * 1024, max(4 * 1024 * 1024, 8 * vmem_needed)))

    cost = pl.CostEstimate(
        flops=2 * b_pad * E + 2 * b_pad,
        transcendentals=b_pad,
        bytes_accessed=2 * b_pad * E * 4 + 2 * b_pad * 4 + b_pad * 4,
    )

    out = pl.pallas_call(
        gmf_kernel,
        out_shape=jax.ShapeDtypeStruct((b_pad, 1), jnp.float32),
        grid_spec=pltpu.PrefetchScalarGridSpec(
            num_scalar_prefetch=2,                                   # uidx, iidx -> SMEM
            grid=(num_tiles,),
            in_specs=[
                pl.BlockSpec(memory_space=pl.ANY),                   # user table (HBM)
                pl.BlockSpec(memory_space=pl.ANY),                   # item table (HBM)
                pl.BlockSpec(memory_space=pltpu.MemorySpace.SMEM),   # bias scalar
            ],
            out_specs=pl.BlockSpec((tb, 1), lambda t, uidx, iidx: (t, 0)),
            scratch_shapes=[
                pltpu.VMEM((tb, E), jnp.float32),    # gathered user rows
                pltpu.VMEM((tb, E), jnp.float32),    # gathered item rows
                pltpu.SemaphoreType.DMA((2,)),
            ],
        ),
        compiler_params=pltpu.CompilerParams(
            dimension_semantics=("parallel",),
            vmem_limit_bytes=vmem_limit,
        ),
        cost_estimate=cost,
    )(uidx, iidx, ut, it, b2)

    return out[:B]


def gmf_reference(user_input, item_input, user_table, item_table, weight, bias):
    u = user_table[user_input]                # (B, E)
    i = item_table[item_input]                # (B, E)
    p = u * i
    return jax.nn.sigmoid(p @ weight.reshape(-1, 1) + bias.reshape(1, 1))


if __name__ == "__main__":
    # Small synthetic configuration consistent with the module's __init__.
    n_users, n_items, embedding_size = 64, 128, 32
    batch = 8

    key = jax.random.PRNGKey(0)
    k_ue, k_ie, k_w, k_b, k_u, k_i = jax.random.split(key, 6)

    # Deterministic parameter init (shapes match nn.Embedding / nn.Linear).
    user_table = jax.random.normal(k_ue, (n_users, embedding_size), jnp.float32)
    item_table = jax.random.normal(k_ie, (n_items, embedding_size), jnp.float32)
    bound = 1.0 / float(embedding_size) ** 0.5
    linear_w = jax.random.uniform(k_w, (embedding_size, 1), jnp.float32, -bound, bound)
    linear_b = jax.random.uniform(k_b, (1,), jnp.float32, -bound, bound)

    # Deterministic integer inputs (the nn.Embedding indices).
    user_input = jax.random.randint(k_u, (batch,), 0, n_users)
    item_input = jax.random.randint(k_i, (batch,), 0, n_items)

    # One-time (model init) layout prep: fold the Linear weight into the user table.
    user_table_w = prepare_gmf_params(user_table, linear_w)

    out = gmf_forward(user_input, item_input, user_table_w, item_table, linear_b)
    out = jax.block_until_ready(out)

    ref = gmf_reference(user_input, item_input, user_table, item_table,
                        linear_w, linear_b)
    assert out.shape == (batch, 1)
    assert jnp.allclose(out, ref, atol=1e-5, rtol=1e-5)

    print("KERNEL_OK")
</pallas_src>

<mosaic_0001>
module attributes {stable_mosaic.version = 11 : i64} {
  func.func @gmf_kernel(%arg0: i32, %arg1: memref<8xi32, #tpu.memory_space<smem>>, %arg2: memref<8xi32, #tpu.memory_space<smem>>, %arg3: memref<64x32xf32, #tpu.memory_space<any>>, %arg4: memref<128x32xf32, #tpu.memory_space<any>>, %arg5: memref<1x1xf32, #tpu.memory_space<smem>>, %arg6: memref<8x1xf32, #tpu.memory_space<vmem>>, %arg7: memref<8x32xf32, #tpu.memory_space<vmem>>, %arg8: memref<8x32xf32, #tpu.memory_space<vmem>>, %arg9: memref<2x!tpu.dma_semaphore, #tpu.memory_space<semaphore_mem>>) attributes {dimension_semantics = [#tpu.dimension_semantics<parallel>], iteration_bounds = array<i64: 1>, scalar_prefetch = 2 : i64, scratch_operands = 3 : i64, tpu.core_type = #tpu.core_type<tc>, window_params = [{}, {}, {transform_indices = @transform_2, window_bounds = array<i64: 1, 1>}, {transform_indices = @transform_3, window_bounds = array<i64: 8, 1>}]} {
    %c8_i32 = arith.constant 8 : i32
    %0 = arith.muli %arg0, %c8_i32 : i32
    %c0_i32 = arith.constant 0 : i32
    %c8_i32_0 = arith.constant 8 : i32
    %1 = arith.addi %c0_i32, %c8_i32_0 : i32
    %c1_i32 = arith.constant 1 : i32
    scf.for %arg10 = %c0_i32 to %1 step %c1_i32  : i32 {
      %c1_i32_14 = arith.constant 1 : i32
      %17 = arith.muli %arg10, %c1_i32_14 : i32
      %c0_i32_15 = arith.constant 0 : i32
      %18 = arith.addi %c0_i32_15, %17 : i32
      %19 = arith.addi %0, %18 : i32
      %20 = arith.index_cast %19 : i32 to index
      %21 = memref.load %arg1[%20] : memref<8xi32, #tpu.memory_space<smem>>
      %c0_i32_16 = arith.constant 0 : i32
      %c0_i32_17 = arith.constant 0 : i32
      %22 = tpu.memref_slice %arg3[%21, %c0_i32_17] : memref<64x32xf32, #tpu.memory_space<any>> -> memref<1x32xf32, #tpu.memory_space<any>>
      %c0_i32_18 = arith.constant 0 : i32
      %23 = tpu.memref_slice %arg7[%18, %c0_i32_18] : memref<8x32xf32, #tpu.memory_space<vmem>> -> memref<1x32xf32, #tpu.memory_space<vmem>>
      %24 = tpu.memref_slice %arg9[%c0_i32_16] : memref<2x!tpu.dma_semaphore, #tpu.memory_space<semaphore_mem>> -> memref<1x!tpu.dma_semaphore, #tpu.memory_space<semaphore_mem>>
      %25 = tpu.memref_squeeze %24 : memref<1x!tpu.dma_semaphore, #tpu.memory_space<semaphore_mem>> -> memref<!tpu.dma_semaphore, #tpu.memory_space<semaphore_mem>>
      tpu.enqueue_dma source(%22 : memref<1x32xf32, #tpu.memory_space<any>>) target(%23 : memref<1x32xf32, #tpu.memory_space<vmem>>) target_semaphore(%25 : memref<!tpu.dma_semaphore, #tpu.memory_space<semaphore_mem>>)
      %26 = arith.addi %0, %18 : i32
      %27 = arith.index_cast %26 : i32 to index
      %28 = memref.load %arg2[%27] : memref<8xi32, #tpu.memory_space<smem>>
      %c1_i32_19 = arith.constant 1 : i32
      %c0_i32_20 = arith.constant 0 : i32
      %29 = tpu.memref_slice %arg4[%28, %c0_i32_20] : memref<128x32xf32, #tpu.memory_space<any>> -> memref<1x32xf32, #tpu.memory_space<any>>
      %c0_i32_21 = arith.constant 0 : i32
      %30 = tpu.memref_slice %arg8[%18, %c0_i32_21] : memref<8x32xf32, #tpu.memory_space<vmem>> -> memref<1x32xf32, #tpu.memory_space<vmem>>
      %31 = tpu.memref_slice %arg9[%c1_i32_19] : memref<2x!tpu.dma_semaphore, #tpu.memory_space<semaphore_mem>> -> memref<1x!tpu.dma_semaphore, #tpu.memory_space<semaphore_mem>>
      %32 = tpu.memref_squeeze %31 : memref<1x!tpu.dma_semaphore, #tpu.memory_space<semaphore_mem>> -> memref<!tpu.dma_semaphore, #tpu.memory_space<semaphore_mem>>
      tpu.enqueue_dma source(%29 : memref<1x32xf32, #tpu.memory_space<any>>) target(%30 : memref<1x32xf32, #tpu.memory_space<vmem>>) target_semaphore(%32 : memref<!tpu.dma_semaphore, #tpu.memory_space<semaphore_mem>>)
    }
    %c8_i32_1 = arith.constant 8 : i32
    %c0_i32_2 = arith.constant 0 : i32
    %c8_i32_3 = arith.constant 8 : i32
    %2 = arith.addi %c0_i32_2, %c8_i32_3 : i32
    %c1_i32_4 = arith.constant 1 : i32
    scf.for %arg10 = %c0_i32_2 to %2 step %c1_i32_4  : i32 {
      %c1_i32_14 = arith.constant 1 : i32
      %17 = arith.muli %arg10, %c1_i32_14 : i32
      %c0_i32_15 = arith.constant 0 : i32
      %18 = arith.addi %c0_i32_15, %17 : i32
      %c0_i32_16 = arith.constant 0 : i32
      %c0_i32_17 = arith.constant 0 : i32
      %c0_i32_18 = arith.constant 0 : i32
      %19 = tpu.memref_slice %arg3[%c0_i32_17, %c0_i32_18] : memref<64x32xf32, #tpu.memory_space<any>> -> memref<1x32xf32, #tpu.memory_space<any>>
      %c0_i32_19 = arith.constant 0 : i32
      %20 = tpu.memref_slice %arg7[%18, %c0_i32_19] : memref<8x32xf32, #tpu.memory_space<vmem>> -> memref<1x32xf32, #tpu.memory_space<vmem>>
      %21 = tpu.memref_slice %arg9[%c0_i32_16] : memref<2x!tpu.dma_semaphore, #tpu.memory_space<semaphore_mem>> -> memref<1x!tpu.dma_semaphore, #tpu.memory_space<semaphore_mem>>
      %22 = tpu.memref_squeeze %21 : memref<1x!tpu.dma_semaphore, #tpu.memory_space<semaphore_mem>> -> memref<!tpu.dma_semaphore, #tpu.memory_space<semaphore_mem>>
      tpu.wait_dma2 semaphore(%22 : memref<!tpu.dma_semaphore, #tpu.memory_space<semaphore_mem>>) src(%19 : memref<1x32xf32, #tpu.memory_space<any>>) dst(%20 : memref<1x32xf32, #tpu.memory_space<vmem>>)
      %c1_i32_20 = arith.constant 1 : i32
      %c0_i32_21 = arith.constant 0 : i32
      %c0_i32_22 = arith.constant 0 : i32
      %23 = tpu.memref_slice %arg4[%c0_i32_21, %c0_i32_22] : memref<128x32xf32, #tpu.memory_space<any>> -> memref<1x32xf32, #tpu.memory_space<any>>
      %c0_i32_23 = arith.constant 0 : i32
      %24 = tpu.memref_slice %arg8[%18, %c0_i32_23] : memref<8x32xf32, #tpu.memory_space<vmem>> -> memref<1x32xf32, #tpu.memory_space<vmem>>
      %25 = tpu.memref_slice %arg9[%c1_i32_20] : memref<2x!tpu.dma_semaphore, #tpu.memory_space<semaphore_mem>> -> memref<1x!tpu.dma_semaphore, #tpu.memory_space<semaphore_mem>>
      %26 = tpu.memref_squeeze %25 : memref<1x!tpu.dma_semaphore, #tpu.memory_space<semaphore_mem>> -> memref<!tpu.dma_semaphore, #tpu.memory_space<semaphore_mem>>
      tpu.wait_dma2 semaphore(%26 : memref<!tpu.dma_semaphore, #tpu.memory_space<semaphore_mem>>) src(%23 : memref<1x32xf32, #tpu.memory_space<any>>) dst(%24 : memref<1x32xf32, #tpu.memory_space<vmem>>)
    }
    %c8_i32_5 = arith.constant 8 : i32
    %c0 = arith.constant 0 : index
    %c0_6 = arith.constant 0 : index
    %3 = vector.load %arg7[%c0, %c0_6] : memref<8x32xf32, #tpu.memory_space<vmem>>, vector<8x32xf32>
    %c0_7 = arith.constant 0 : index
    %c0_8 = arith.constant 0 : index
    %4 = vector.load %arg8[%c0_7, %c0_8] : memref<8x32xf32, #tpu.memory_space<vmem>>, vector<8x32xf32>
    %5 = arith.mulf %3, %4 : vector<8x32xf32>
    %cst = arith.constant dense<0.000000e+00> : vector<8xf32>
    %6 = vector.multi_reduction <add>, %5, %cst [1] : vector<8x32xf32> to vector<8xf32>
    %7 = vector.shape_cast %6 : vector<8xf32> to vector<8x1xf32>
    %c0_9 = arith.constant 0 : index
    %c0_10 = arith.constant 0 : index
    %8 = memref.load %arg5[%c0_9, %c0_10] : memref<1x1xf32, #tpu.memory_space<smem>>
    %9 = vector.broadcast %8 : f32 to vector<8x1xf32>
    %10 = arith.addf %7, %9 : vector<8x1xf32>
    %11 = arith.negf %10 : vector<8x1xf32>
    %12 = math.exp %11 : vector<8x1xf32>
    %cst_11 = arith.constant 1.000000e+00 : f32
    %13 = vector.broadcast %cst_11 : f32 to vector<8x1xf32>
    %14 = arith.addf %13, %12 : vector<8x1xf32>
    %15 = arith.divf %13, %14 : vector<8x1xf32>
    %c0_12 = arith.constant 0 : index
    %c0_13 = arith.constant 0 : index
    %16 = vector.load %arg6[%c0_12, %c0_13] : memref<8x1xf32, #tpu.memory_space<vmem>>, vector<8x1xf32>
    tpu.vector_store %arg6[%c0_12, %c0_13], %15 {strides = array<i32>} : memref<8x1xf32, #tpu.memory_space<vmem>>, vector<8x1xf32>,
    return
  }
  func.func @transform_2(%arg0: i32, %arg1: memref<8xi32, #tpu.memory_space<smem>>, %arg2: memref<8xi32, #tpu.memory_space<smem>>) -> (i32, i32) {
    %c0_i32 = arith.constant 0 : i32
    %c0_i32_0 = arith.constant 0 : i32
    %c0_i32_1 = arith.constant 0 : i32
    return %c0_i32, %c0_i32_0 : i32, i32
  }
  func.func @transform_3(%arg0: i32, %arg1: memref<8xi32, #tpu.memory_space<smem>>, %arg2: memref<8xi32, #tpu.memory_space<smem>>) -> (i32, i32) {
    %c0_i32 = arith.constant 0 : i32
    %c0_i32_0 = arith.constant 0 : i32
    return %arg0, %c0_i32 : i32, i32
  }
}

</mosaic_0001>

<bundles_post_ra>
// kernel: gmf_forward.1
= control target key start
LH: loop header
LB: loop body
LE: loop exit
PB: predicated region body
PF: predicated region fallthrough
CT: control target
= control target key end

     0   :  { %s332_s0 = inlined_call_operand.vmem [shape: s32[8], index: 0, kind: input, shape index: {}]   ;;  %s333_s2 = inlined_call_operand.vmem [shape: f32[64,32], index: 2, kind: input, shape index: {}]   ;;  %s334_s3 = inlined_call_operand.vmem [shape: f32[128,32], index: 3, kind: input, shape index: {}]   ;;  %s335_s5 = inlined_call_operand.vmem [shape: f32[8,1], index: 5, kind: output, shape index: {}]   ;;  %s336_s1 = inlined_call_operand.vmem [shape: s32[8], index: 1, kind: input, shape index: {}]   ;;  %s337_s4 = inlined_call_operand.<no memory space> [shape: f32[1,1], index: 4, kind: input, shape index: {}]  }
   0x1   :  { %s10_s20 = sshll.u32 %s332_s0, 4  ;;  %s14_s23 = sshll.u32 %s336_s1, 4  ;;  %s11_s20 = int_to_ptr.vmem [resolvable:$true] %s10_s20  ;;  %s15_s23 = int_to_ptr.vmem [resolvable:$true] %s14_s23 }
   0x2   :  { %s236_s24 = scalar_lea.vmem %s11_s20, 16  ;;  %p241_p1 = scmp.lt.s32.totalorder %s11_s20, %s11_s20 }
   0x3   :  { %p237_p0 = scmp.ne.s32.totalorder %s11_s20, %s236_s24  ;;  %p242_p2 = scmp.lt.s32.totalorder %s236_s24, %s236_s24 }
   0x5   :  { %p243_p3 = por %p242_p2, %p241_p1 }
   0x7   :  { %p244_p4 = pnand %p243_p3, %p237_p0 }
   0x9   :  { %247 = shalt.err (!%p244_p4)  }
   0xa   :  { %s282_s25 = smov [#allocation6]   ;;  %s248_s26 = scalar_lea.vmem %s15_s23, 16 }
   0xb   :  { %13 = dma.vmem_to_smem %s11_s20, 16, %s282_s25, [#allocation5] }
   0xc   :  { %p249_p5 = scmp.ne.s32.totalorder %s15_s23, %s248_s26  ;;  %p253_p6 = scmp.lt.s32.totalorder %s15_s23, %s15_s23 }
   0xd   :  { %p254_p7 = scmp.lt.s32.totalorder %s248_s26, %s248_s26 }
   0xf   :  { %p255_p8 = por %p254_p7, %p253_p6 }
  0x11   :  { %p256_p9 = pnand %p255_p8, %p249_p5 }
  0x13   :  { %259 = shalt.err (!%p256_p9)  }
  0x14   :  { %s283_s0 = smov [#allocation7]   ;;  %18 = sst [smem:[#allocation8]] %s337_s4 }
  0x15   :  { %17 = dma.vmem_to_smem %s15_s23, 16, %s283_s0, [#allocation5] }
  0x16   :  { %268 = dma.done.wait [#allocation5], 32 }
  0x17   :  { %269 = vsyncadd [#allocation5], 4294967264 }
  0x18   :  { %20 = sfence }
  0x19   :  { %s274_s28 = smov 0  }
  0x1a LB: > { %s31_s29 = sld [smem:[#allocation6 + %s276_s28]]  ;;  %s33_s8 = scalar_lea.vmem [#allocation2], %s276_s28  ;;  %s276_s28 = sphi %s274_s28, %s29_s28  }
  0x20   : > { %s32_s7 = scalar_lea.vmem %s333_s2, %s31_s29 }
  0x21   : > { %v52_v0 = vld [vmem:[%s32_s7] sm:$0x1] }
  0x22   : > { %53 = vst [vmem:[%s33_s8] sm:$0x1] %v52_v0 }
  0x23   : > { %79 = vsyncadd [#allocation4], 16  ;;  %s80_s9 = sld [smem:[#allocation7 + %s276_s28]]  ;;  %s82_s12 = scalar_lea.vmem [#allocation3], %s276_s28 }
  0x29   : > { %s81_s4 = scalar_lea.vmem %s334_s3, %s80_s9 }
  0x2a   : > { %v102_v1 = vld [vmem:[%s81_s4] sm:$0x1] }
  0x2b   : > { %103 = vst [vmem:[%s82_s12] sm:$0x1] %v102_v1 }
  0x2c   : > { %129 = vsyncadd [#allocation4 + $0x1], 16  ;;  %s29_s28 = sadd.s32 1, %s276_s28  }
  0x2d   : > { %p26_p10 = scmp.ge.s32.totalorder %s29_s28, 8  }
  0x2e   :  { %s278_s13 = smov (%p26_p10), 0  }
  0x2f   :  { %28 = sbr.rel (!%p26_p10) target bundleno = 26 (0x1a), region = 125 }
  0x34 LB: > { %270 = dma.done.wait [#allocation4], 16  ;;  %s280_s13 = sphi %s278_s13, %s135_s13  }
  0x35   : > { %271 = vsyncadd [#allocation4], 4294967280 }
  0x36   : > { %272 = dma.done.wait [#allocation4 + $0x1], 16 }
  0x37   : > { %273 = vsyncadd [#allocation4 + $0x1], 4294967280  ;;  %s135_s13 = sadd.s32 1, %s280_s13  }
  0x38   : > { %p132_p11 = scmp.ge.s32.totalorder %s135_s13, 8  }
  0x39   :  { %v142_v2 = vld [vmem:[#allocation2] sm:$0xff] (%p132_p11)  ;;  %v143_v3 = vld [vmem:[#allocation3] sm:$0xff] (%p132_p11)  ;;  %vm145_vm0 = vcmask (%p132_p11), 261120   ;;  %s149_s14 = sld [smem:[#allocation8]] (%p132_p11)  ;;  %vm158_vm1 = vcmask (%p132_p11), 7168  }
  0x3a   :  { %134 = sbr.rel (!%p132_p11) target bundleno = 52 (0x34), region = 136  ;;  %v144_v4 = vmul.f32 (%p132_p11), %v143_v3, %v142_v2 }
  0x3c   :  { %v146_v5 = vsel (%p132_p11), %vm145_vm0, %v144_v4, 0.0 }
  0x3d   :  { %147 = vadd.xlane.f32.xlu0 (%p132_p11), %v146_v5 }
  0x3f   :  { %v150_v6 = vstv %s149_s14 }
  0xc6   :  { %v148_v7 = vpop.xlane.xlu0 %147 }
  0xc7   :  { %v151_v8 = vadd.f32 %v150_v6, %v148_v7 }
  0xc9   :  { %v211_v9 = vmul.f32 -1.442695, %v151_v8 }
  0xcb   :  { %232 = vpow2.f32 %v211_v9 }
  0xd8   :  { %v233_v10 = vpop.eup %232 }
  0xd9   :  { %v155_v11 = vadd.f32 1.0, %v233_v10 }
  0xdb   :  { %234 = vrcp.f32 %v155_v11 }
  0xe8   :  { %v235_v12 = vpop.eup %234 }
  0xe9   :  { %159 = vst.msk [vmem:[%s335_s5] sm:$0xff] %vm158_vm1, %v235_v12 }
  0xea   :  { %164 = vsyncmov [#allocation4] }
  0xed   :  { %s165_s15 = vpop.sfrf %164 }
  0xee   :  { %p212_p12 = scmp.ne.s32.totalorder %s165_s15, 0 }
  0xf0   :  { %169 = shalt.err (%p212_p12)  }
  0xf1   :  { %171 = vsyncmov [#allocation4 + $0x1] }
  0xf4   :  { %s172_s16 = vpop.sfrf %171 }
  0xf5   :  { %p213_p13 = scmp.ne.s32.totalorder %s172_s16, 0 }
  0xf7   :  { %176 = shalt.err (%p213_p13)  }

</bundles_post_ra>
